<compile_context>
chip_gen: v7x
topology: tpu7x:2x2x1
jax: 0.10.0
libtpu: 0.0.40
codegen_flags: <defaults>
</compile_context>

<pallas_src>
import jax
import jax.numpy as jnp
from jax.experimental import pallas as pl
from jax.experimental.pallas import tpu as pltpu


_LANE = 128       # lane width: pad last (feature) dims to multiples of this
_SUBLANE_BF16 = 16  # bf16 sublane packing granularity
_TB_BIG = 256     # batch tile per grid step for large batches


def _round_up(n, m):
    return ((n + m - 1) // m) * m


def _big_encoder_kernel(x_ref, w1_ref, b1_ref, w2_ref, b2_ref, w3_ref, b3_ref,
                        o_ref):
    """Fused MLP hot path: 3 MXU matmuls (bf16 operands, f32 acc) + 2 f32 ReLUs."""
    x = x_ref[...]                                           # (TB, IN_P) bf16

    h1 = jnp.dot(x, w1_ref[...], preferred_element_type=jnp.float32)
    h1 = jnp.maximum(h1 + b1_ref[...], 0.0)                  # f32 epilogue

    h2 = jnp.dot(h1.astype(w2_ref.dtype), w2_ref[...],
                 preferred_element_type=jnp.float32)
    h2 = jnp.maximum(h2 + b2_ref[...], 0.0)

    out = jnp.dot(h2.astype(w3_ref.dtype), w3_ref[...],
                  preferred_element_type=jnp.float32)
    o_ref[...] = (out + b3_ref[...]).astype(o_ref.dtype)


@jax.jit
def big_encoder_forward(x, w1, b1, w2, b2, w3, b3):
    """Fused BigEncoder forward as one pallas_call.

    The wrapper pads feature dims to 128 multiples (lane-dense tiles) and the
    batch to a multiple of the batch tile, runs a 1-D grid over batch tiles
    with the weights VMEM-resident, then slices the padded output back.
    """
    B, in_size = x.shape
    hid = w1.shape[1]
    out_size = w3.shape[1]

    in_p = _round_up(in_size, _LANE)
    hid_p = _round_up(hid, _LANE)
    out_p = _round_up(out_size, _LANE)

    # Adaptive batch tile: single small tile for small B, big tiles for big B.
    if B >= _TB_BIG:
        tb = _TB_BIG
    else:
        tb = _round_up(B, _SUBLANE_BF16)
    b_p = _round_up(B, tb)
    out_dtype = x.dtype

    # Zero padding is exact for a linear layer: padded input features hit
    # zero weight rows, padded hidden columns get zero weight+bias -> ReLU(0)=0,
    # padded output columns are sliced away.
    xp = jnp.pad(x, ((0, b_p - B), (0, in_p - in_size))).astype(jnp.bfloat16)
    w1p = jnp.pad(w1, ((0, in_p - in_size), (0, hid_p - hid))).astype(jnp.bfloat16)
    w2p = jnp.pad(w2, ((0, hid_p - hid), (0, hid_p - hid))).astype(jnp.bfloat16)
    w3p = jnp.pad(w3, ((0, hid_p - hid), (0, out_p - out_size))).astype(jnp.bfloat16)
    b1p = jnp.pad(b1, ((0, 0), (0, hid_p - hid))).astype(jnp.float32)
    b2p = jnp.pad(b2, ((0, 0), (0, hid_p - hid))).astype(jnp.float32)
    b3p = jnp.pad(b3, ((0, 0), (0, out_p - out_size))).astype(jnp.float32)

    # Weights / biases: same block every grid step => stay resident in VMEM.
    resident = lambda shape: pl.BlockSpec(shape, lambda i: (0, 0))

    out_padded = pl.pallas_call(
        _big_encoder_kernel,
        out_shape=jax.ShapeDtypeStruct((b_p, out_p), out_dtype),
        grid=(b_p // tb,),
        in_specs=[
            pl.BlockSpec((tb, in_p), lambda i: (i, 0)),       # x: tiled on batch
            resident((in_p, hid_p)), resident((1, hid_p)),    # layer 1
            resident((hid_p, hid_p)), resident((1, hid_p)),   # layer 2
            resident((hid_p, out_p)), resident((1, out_p)),   # layer 3
        ],
        out_specs=pl.BlockSpec((tb, out_p), lambda i: (i, 0)),
        compiler_params=pltpu.CompilerParams(
            dimension_semantics=("parallel",),     # megacore/v7x: shard batch tiles
            vmem_limit_bytes=64 * 1024 * 1024,     # budget against v7x 64 MiB VMEM
        ),
    )(xp, w1p, b1p, w2p, b2p, w3p, b3p)

    return out_padded[:B, :out_size]


def init_big_encoder_params(key, input_size, hidden_size, output_size,
                            dtype=jnp.float32):
    """PyTorch-style (Kaiming-uniform-ish) init; weights in (in, out) layout."""
    def linear_init(k, fan_in, fan_out):
        kw, kb = jax.random.split(k)
        bound = 1.0 / jnp.sqrt(jnp.asarray(fan_in, dtype=jnp.float32))
        w = jax.random.uniform(kw, (fan_in, fan_out), dtype, -bound, bound)
        b = jax.random.uniform(kb, (1, fan_out), dtype, -bound, bound)
        return w, b

    k1, k2, k3 = jax.random.split(key, 3)
    w1, b1 = linear_init(k1, input_size, hidden_size)
    w2, b2 = linear_init(k2, hidden_size, hidden_size)
    w3, b3 = linear_init(k3, hidden_size, output_size)
    return w1, b1, w2, b2, w3, b3


def big_encoder_reference(x, w1, b1, w2, b2, w3, b3):
    """Pure-JAX f32 reference matching torch semantics."""
    h1 = jnp.maximum(x @ w1 + b1, 0.0)
    h2 = jnp.maximum(h1 @ w2 + b2, 0.0)
    return h2 @ w3 + b3


if __name__ == "__main__":
    input_size, hidden_size, output_size = 24, 32, 16
    batch = 8

    key = jax.random.PRNGKey(0)
    k_params, k_x = jax.random.split(key)

    params = init_big_encoder_params(k_params, input_size, hidden_size,
                                     output_size)
    x = jax.random.normal(k_x, (batch, input_size), dtype=jnp.float32)

    out = jax.block_until_ready(big_encoder_forward(x, *params))
    ref = big_encoder_reference(x, *params)

    assert out.shape == (batch, output_size), out.shape
    # bf16 MXU operands with f32 accumulation => relaxed tolerance vs f32 ref.
    assert jnp.allclose(out, ref, atol=3e-2, rtol=3e-2), \
        float(jnp.max(jnp.abs(out - ref)))

    print("KERNEL_OK")
</pallas_src>

<mosaic_0001>
module attributes {stable_mosaic.version = 11 : i64} {
  func.func @_big_encoder_kernel(%arg0: i32, %arg1: memref<16x128xbf16, #tpu.memory_space<vmem>>, %arg2: memref<128x128xbf16, #tpu.memory_space<vmem>>, %arg3: memref<1x128xf32, #tpu.memory_space<vmem>>, %arg4: memref<128x128xbf16, #tpu.memory_space<vmem>>, %arg5: memref<1x128xf32, #tpu.memory_space<vmem>>, %arg6: memref<128x128xbf16, #tpu.memory_space<vmem>>, %arg7: memref<1x128xf32, #tpu.memory_space<vmem>>, %arg8: memref<16x128xf32, #tpu.memory_space<vmem>>) attributes {dimension_semantics = [#tpu.dimension_semantics<parallel>], iteration_bounds = array<i64: 1>, scalar_prefetch = 0 : i64, scratch_operands = 0 : i64, tpu.core_type = #tpu.core_type<tc>, window_params = [{transform_indices = @transform_0, window_bounds = array<i64: 16, 128>}, {pipeline_mode = #tpu.pipeline_mode<synchronous>, transform_indices = @transform_1, window_bounds = array<i64: 128, 128>}, {pipeline_mode = #tpu.pipeline_mode<synchronous>, transform_indices = @transform_2, window_bounds = array<i64: 1, 128>}, {pipeline_mode = #tpu.pipeline_mode<synchronous>, transform_indices = @transform_3, window_bounds = array<i64: 128, 128>}, {pipeline_mode = #tpu.pipeline_mode<synchronous>, transform_indices = @transform_4, window_bounds = array<i64: 1, 128>}, {pipeline_mode = #tpu.pipeline_mode<synchronous>, transform_indices = @transform_5, window_bounds = array<i64: 128, 128>}, {pipeline_mode = #tpu.pipeline_mode<synchronous>, transform_indices = @transform_6, window_bounds = array<i64: 1, 128>}, {transform_indices = @transform_7, window_bounds = array<i64: 16, 128>}]} {
    %c0 = arith.constant 0 : index
    %c0_0 = arith.constant 0 : index
    %0 = vector.load %arg1[%c0, %c0_0] : memref<16x128xbf16, #tpu.memory_space<vmem>>, vector<16x128xbf16>
    %c0_1 = arith.constant 0 : index
    %c0_2 = arith.constant 0 : index
    %1 = vector.load %arg2[%c0_1, %c0_2] : memref<128x128xbf16, #tpu.memory_space<vmem>>, vector<128x128xbf16>
    %cst = arith.constant dense<0.000000e+00> : vector<16x128xf32>
    %2 = tpu.matmul %0, %1, %cst {dimension_numbers = #tpu.dot_dimension_numbers<[1], [0], [0], [1], [0, 0, 1, 1], [], []>} : vector<16x128xbf16>, vector<128x128xbf16>, vector<16x128xf32> -> vector<16x128xf32>
    %c0_3 = arith.constant 0 : index
    %c0_4 = arith.constant 0 : index
    %3 = vector.load %arg3[%c0_3, %c0_4] : memref<1x128xf32, #tpu.memory_space<vmem>>, vector<1x128xf32>
    %4 = vector.broadcast %3 : vector<1x128xf32> to vector<16x128xf32>
    %5 = arith.addf %2, %4 : vector<16x128xf32>
    %cst_5 = arith.constant 0.000000e+00 : f32
    %6 = vector.broadcast %cst_5 : f32 to vector<16x128xf32>
    %7 = arith.maximumf %5, %6 : vector<16x128xf32>
    %8 = arith.truncf %7 : vector<16x128xf32> to vector<16x128xbf16>
    %c0_6 = arith.constant 0 : index
    %c0_7 = arith.constant 0 : index
    %9 = vector.load %arg4[%c0_6, %c0_7] : memref<128x128xbf16, #tpu.memory_space<vmem>>, vector<128x128xbf16>
    %cst_8 = arith.constant dense<0.000000e+00> : vector<16x128xf32>
    %10 = tpu.matmul %8, %9, %cst_8 {dimension_numbers = #tpu.dot_dimension_numbers<[1], [0], [0], [1], [0, 0, 1, 1], [], []>} : vector<16x128xbf16>, vector<128x128xbf16>, vector<16x128xf32> -> vector<16x128xf32>
    %c0_9 = arith.constant 0 : index
    %c0_10 = arith.constant 0 : index
    %11 = vector.load %arg5[%c0_9, %c0_10] : memref<1x128xf32, #tpu.memory_space<vmem>>, vector<1x128xf32>
    %12 = vector.broadcast %11 : vector<1x128xf32> to vector<16x128xf32>
    %13 = arith.addf %10, %12 : vector<16x128xf32>
    %cst_11 = arith.constant 0.000000e+00 : f32
    %14 = vector.broadcast %cst_11 : f32 to vector<16x128xf32>
    %15 = arith.maximumf %13, %14 : vector<16x128xf32>
    %16 = arith.truncf %15 : vector<16x128xf32> to vector<16x128xbf16>
    %c0_12 = arith.constant 0 : index
    %c0_13 = arith.constant 0 : index
    %17 = vector.load %arg6[%c0_12, %c0_13] : memref<128x128xbf16, #tpu.memory_space<vmem>>, vector<128x128xbf16>
    %cst_14 = arith.constant dense<0.000000e+00> : vector<16x128xf32>
    %18 = tpu.matmul %16, %17, %cst_14 {dimension_numbers = #tpu.dot_dimension_numbers<[1], [0], [0], [1], [0, 0, 1, 1], [], []>} : vector<16x128xbf16>, vector<128x128xbf16>, vector<16x128xf32> -> vector<16x128xf32>
    %c0_15 = arith.constant 0 : index
    %c0_16 = arith.constant 0 : index
    %19 = vector.load %arg7[%c0_15, %c0_16] : memref<1x128xf32, #tpu.memory_space<vmem>>, vector<1x128xf32>
    %20 = vector.broadcast %19 : vector<1x128xf32> to vector<16x128xf32>
    %21 = arith.addf %18, %20 : vector<16x128xf32>
    %c0_17 = arith.constant 0 : index
    %c0_18 = arith.constant 0 : index
    %22 = vector.load %arg8[%c0_17, %c0_18] : memref<16x128xf32, #tpu.memory_space<vmem>>, vector<16x128xf32>
    tpu.vector_store %arg8[%c0_17, %c0_18], %21 {strides = array<i32>} : memref<16x128xf32, #tpu.memory_space<vmem>>, vector<16x128xf32>,
    return
  }
  func.func @transform_0(%arg0: i32) -> (i32, i32) {
    %c0_i32 = arith.constant 0 : i32
    %c0_i32_0 = arith.constant 0 : i32
    return %arg0, %c0_i32 : i32, i32
  }
  func.func @transform_1(%arg0: i32) -> (i32, i32) {
    %c0_i32 = arith.constant 0 : i32
    %c0_i32_0 = arith.constant 0 : i32
    %c0_i32_1 = arith.constant 0 : i32
    return %c0_i32, %c0_i32_0 : i32, i32
  }
  func.func @transform_2(%arg0: i32) -> (i32, i32) {
    %c0_i32 = arith.constant 0 : i32
    %c0_i32_0 = arith.constant 0 : i32
    %c0_i32_1 = arith.constant 0 : i32
    return %c0_i32, %c0_i32_0 : i32, i32
  }
  func.func @transform_3(%arg0: i32) -> (i32, i32) {
    %c0_i32 = arith.constant 0 : i32
    %c0_i32_0 = arith.constant 0 : i32
    %c0_i32_1 = arith.constant 0 : i32
    return %c0_i32, %c0_i32_0 : i32, i32
  }
  func.func @transform_4(%arg0: i32) -> (i32, i32) {
    %c0_i32 = arith.constant 0 : i32
    %c0_i32_0 = arith.constant 0 : i32
    %c0_i32_1 = arith.constant 0 : i32
    return %c0_i32, %c0_i32_0 : i32, i32
  }
  func.func @transform_5(%arg0: i32) -> (i32, i32) {
    %c0_i32 = arith.constant 0 : i32
    %c0_i32_0 = arith.constant 0 : i32
    %c0_i32_1 = arith.constant 0 : i32
    return %c0_i32, %c0_i32_0 : i32, i32
  }
  func.func @transform_6(%arg0: i32) -> (i32, i32) {
    %c0_i32 = arith.constant 0 : i32
    %c0_i32_0 = arith.constant 0 : i32
    %c0_i32_1 = arith.constant 0 : i32
    return %c0_i32, %c0_i32_0 : i32, i32
  }
  func.func @transform_7(%arg0: i32) -> (i32, i32) {
    %c0_i32 = arith.constant 0 : i32
    %c0_i32_0 = arith.constant 0 : i32
    return %arg0, %c0_i32 : i32, i32
  }
}

</mosaic_0001>

<bundles_post_ra>
// kernel: big_encoder_forward.1
= control target key start
LH: loop header
LB: loop body
LE: loop exit
PB: predicated region body
PF: predicated region fallthrough
CT: control target
= control target key end

     0   :  { %12 = vsyncpa [#allocation3], 0  ;;  %s1035_s0 = inlined_call_operand.hbm [shape: bf16[16,128], index: 0, kind: input, shape index: {}]   ;;  %s1036_s1 = inlined_call_operand.hbm [shape: bf16[128,128], index: 1, kind: input, shape index: {}]   ;;  %s1037_s2 = inlined_call_operand.hbm [shape: f32[1,128], index: 2, kind: input, shape index: {}]   ;;  %s1038_s3 = inlined_call_operand.hbm [shape: bf16[128,128], index: 3, kind: input, shape index: {}]   ;;  %s1039_s4 = inlined_call_operand.hbm [shape: f32[1,128], index: 4, kind: input, shape index: {}]   ;;  %s1040_s5 = inlined_call_operand.hbm [shape: bf16[128,128], index: 5, kind: input, shape index: {}]   ;;  %s1041_s6 = inlined_call_operand.hbm [shape: f32[1,128], index: 6, kind: input, shape index: {}]   ;;  %s1042_s7 = inlined_call_operand.hbm [shape: f32[16,128], index: 7, kind: output, shape index: {}]  }
   0x1   :  { %13 = vsyncpa [#allocation6], 0 }
   0x2   :  { %14 = vsyncpa [#allocation9], 0 }
   0x3   :  { %15 = vsyncpa [#allocation12], 0 }
   0x4   :  { %16 = vsyncpa [#allocation4], 0  ;;  %s829_s24 = smov [#allocation5]   ;;  %s830_s26 = smov [#allocation8]  }
   0x5   :  { %s34_s25 = sshll.u32 %s829_s24, 4  ;;  %s56_s27 = sshll.u32 %s830_s26, 4  ;;  %s35_s25 = int_to_ptr.vmem [resolvable:$true] %s34_s25  ;;  %s883_s27 = int_to_ptr.vmem [resolvable:$true] %s56_s27 }
   0x6   :  { %s643_s30 = scalar_lea.hbm %s1036_s1, 1024 }
   0x7   :  { %p644_p0 = scmp.ne.s32.totalorder %s1036_s1, %s643_s30  ;;  %p647_p1 = scmp.lt.u32.totalorder %s643_s30, %s1036_s1 }
   0x9   :  { %p649_p2 = pnand %p647_p1, %p644_p0 }
   0xb   :  { %652 = shalt.err (!%p649_p2)
}
   0xc   :  { %s653_s12 = scalar_lea.vmem %s35_s25, 1024  ;;  %p658_p4 = scmp.lt.s32.totalorder %s35_s25, %s35_s25 }
   0xd   :  { %p654_p3 = scmp.ne.s32.totalorder %s35_s25, %s653_s12  ;;  %p659_p5 = scmp.lt.s32.totalorder %s653_s12, %s653_s12 }
   0xf   :  { %p660_p6 = por %p659_p5, %p658_p4 }
  0x11   :  { %p661_p7 = pnand %p660_p6, %p654_p3 }
  0x13   :  { %664 = shalt.err (!%p661_p7)
}
  0x14   :  { %s831_s13 = smov 64   ;;  %s832_s14 = smov 4  }
  0x15   :  { %40 = dma.hbm_to_vmem [thread:$0]  %s1036_s1, 1024, %s35_s25, [#allocation6], %s831_s13, %s831_s13, %s832_s14  }
  0x16   :  { %s665_s19 = scalar_lea.hbm %s1038_s3, 1024 }
  0x17   :  { %p666_p8 = scmp.ne.s32.totalorder %s1038_s3, %s665_s19  ;;  %p669_p9 = scmp.lt.u32.totalorder %s665_s19, %s1038_s3 }
  0x19   :  { %p671_p10 = pnand %p669_p9, %p666_p8 }
  0x1b   :  { %674 = shalt.err (!%p671_p10)
}
  0x1c   :  { %s675_s24 = scalar_lea.vmem %s883_s27, 1024  ;;  %p680_p12 = scmp.lt.s32.totalorder %s883_s27, %s883_s27 }
  0x1d   :  { %p676_p11 = scmp.ne.s32.totalorder %s883_s27, %s675_s24  ;;  %p681_p13 = scmp.lt.s32.totalorder %s675_s24, %s675_s24 }
  0x1f   :  { %p682_p0 = por %p681_p13, %p680_p12 }
  0x21   :  { %p683_p1 = pnand %p682_p0, %p676_p11 }
  0x23   :  { %686 = shalt.err (!%p683_p1)
}
  0x24   :  { %62 = dma.hbm_to_vmem [thread:$0]  %s1038_s3, 1024, %s883_s27, [#allocation9], %s831_s13, %s831_s13, %s832_s14  }
  0x25   :  { %s833_s26 = smov [#allocation11]   ;;  %s834_s29 = smov [#allocation2]  }
  0x26   :  { %s78_s28 = sshll.u32 %s833_s26, 4  ;;  %s22_s30 = sshll.u32 %s834_s29, 4  ;;  %s79_s28 = int_to_ptr.vmem [resolvable:$true] %s78_s28  ;;  %s920_s30 = int_to_ptr.vmem [resolvable:$true] %s22_s30 }
  0x27   :  { %s687_s10 = scalar_lea.hbm %s1040_s5, 1024 }
  0x28   :  { %p688_p2 = scmp.ne.s32.totalorder %s1040_s5, %s687_s10  ;;  %p691_p3 = scmp.lt.u32.totalorder %s687_s10, %s1040_s5 }
  0x2a   :  { %p693_p4 = pnand %p691_p3, %p688_p2 }
  0x2c   :  { %696 = shalt.err (!%p693_p4)
}
  0x2d   :  { %s697_s3 = scalar_lea.vmem %s79_s28, 1024  ;;  %p702_p6 = scmp.lt.s32.totalorder %s79_s28, %s79_s28 }
  0x2e   :  { %p698_p5 = scmp.ne.s32.totalorder %s79_s28, %s697_s3  ;;  %p703_p7 = scmp.lt.s32.totalorder %s697_s3, %s697_s3 }
  0x30   :  { %p704_p8 = por %p703_p7, %p702_p6 }
  0x32   :  { %p705_p9 = pnand %p704_p8, %p698_p5 }
  0x34   :  { %708 = shalt.err (!%p705_p9)
}
  0x35   :  { %84 = dma.hbm_to_vmem [thread:$0]  %s1040_s5, 1024, %s79_s28, [#allocation12], %s831_s13, %s831_s13, %s832_s14  }
  0x36   :  { %s709_s20 = scalar_lea.hbm %s1035_s0, 128 }
  0x37   :  { %p710_p10 = scmp.ne.s32.totalorder %s1035_s0, %s709_s20  ;;  %p713_p11 = scmp.lt.u32.totalorder %s709_s20, %s1035_s0 }
  0x39   :  { %p715_p12 = pnand %p713_p11, %p710_p10 }
  0x3b   :  { %718 = shalt.err (!%p715_p12)
}
  0x3c   :  { %s719_s1 = scalar_lea.vmem %s920_s30, 128  ;;  %p724_p0 = scmp.lt.s32.totalorder %s920_s30, %s920_s30 }
  0x3d   :  { %p720_p13 = scmp.ne.s32.totalorder %s920_s30, %s719_s1  ;;  %p725_p1 = scmp.lt.s32.totalorder %s719_s1, %s719_s1 }
  0x3f   :  { %p726_p2 = por %p725_p1, %p724_p0 }
  0x41   :  { %p727_p3 = pnand %p726_p2, %p720_p13 }
  0x43   :  { %730 = shalt.err (!%p727_p3)
}
  0x44   :  { %28 = dma.hbm_to_vmem [thread:$0]  %s1035_s0, 128, %s920_s30, [#allocation3], %s831_s13, %s831_s13, %s832_s14  }
  0x45   :  { %s835_s26 = smov [#allocation7]   ;;  %s836_s29 = smov [#allocation10]  }
  0x46   :  { %s47_s28 = sshll.u32 %s835_s26, 4  ;;  %s69_s8 = sshll.u32 %s836_s29, 4  ;;  %s48_s28 = int_to_ptr.vmem [resolvable:$true] %s47_s28  ;;  %s70_s8 = int_to_ptr.vmem [resolvable:$true] %s69_s8 }
  0x47   :  { %s731_s11 = scalar_lea.hbm %s1037_s2, 16 }
  0x48   :  { %p732_p4 = scmp.ne.s32.totalorder %s1037_s2, %s731_s11  ;;  %p735_p5 = scmp.lt.u32.totalorder %s731_s11, %s1037_s2 }
  0x4a   :  { %p737_p6 = pnand %p735_p5, %p732_p4 }
  0x4c   :  { %740 = shalt.err (!%p737_p6)
}
  0x4d   :  { %s741_s0 = scalar_lea.vmem %s48_s28, 16  ;;  %s745_s13 = scalar_lea.vmem %s48_s28, 32 }
  0x4e   :  { %p742_p7 = scmp.ne.s32.totalorder %s48_s28, %s741_s0  ;;  %p746_p8 = scmp.lt.s32.totalorder %s48_s28, %s48_s28 }
  0x4f   :  { %p747_p9 = scmp.lt.s32.totalorder %s745_s13, %s741_s0 }
  0x51   :  { %p748_p10 = por %p747_p9, %p746_p8 }
  0x53   :  { %p749_p11 = pnand %p748_p10, %p742_p7 }
  0x55   :  { %752 = shalt.err (!%p749_p11)
}
  0x56   :  { %50 = dma.hbm_to_vmem [thread:$0]  %s1037_s2, 16, %s48_s28, [#allocation6]  }
  0x57   :  { %s753_s18 = scalar_lea.hbm %s1039_s4, 16 }
  0x58   :  { %p754_p12 = scmp.ne.s32.totalorder %s1039_s4, %s753_s18  ;;  %p757_p13 = scmp.lt.u32.totalorder %s753_s18, %s1039_s4 }
  0x5a   :  { %p759_p0 = pnand %p757_p13, %p754_p12 }
  0x5c   :  { %762 = shalt.err (!%p759_p0)
}
  0x5d   :  { %s763_s23 = scalar_lea.vmem %s70_s8, 16  ;;  %s767_s24 = scalar_lea.vmem %s70_s8, 32 }
  0x5e   :  { %p764_p1 = scmp.ne.s32.totalorder %s70_s8, %s763_s23  ;;  %p768_p2 = scmp.lt.s32.totalorder %s70_s8, %s70_s8 }
  0x5f   :  { %p769_p3 = scmp.lt.s32.totalorder %s767_s24, %s763_s23 }
  0x61   :  { %p770_p4 = por %p769_p3, %p768_p2 }
  0x63   :  { %p771_p5 = pnand %p770_p4, %p764_p1 }
  0x65   :  { %774 = shalt.err (!%p771_p5)
}
  0x66   :  { %72 = dma.hbm_to_vmem [thread:$0]  %s1039_s4, 16, %s70_s8, [#allocation9]  }
  0x67   :  { %s837_s5 = smov [#allocation13]   ;;  %s775_s29 = scalar_lea.hbm %s1041_s6, 16 }
  0x68   :  { %s91_s25 = sshll.u32 %s837_s5, 4  ;;  %p776_p6 = scmp.ne.s32.totalorder %s1041_s6, %s775_s29  ;;  %s92_s25 = int_to_ptr.vmem [resolvable:$true] %s91_s25 }
  0x69   :  { %p779_p7 = scmp.lt.u32.totalorder %s775_s29, %s1041_s6 }
  0x6b   :  { %p781_p8 = pnand %p779_p7, %p776_p6 }
  0x6d   :  { %784 = shalt.err (!%p781_p8)
}
  0x6e   :  { %s785_s15 = scalar_lea.vmem %s92_s25, 16  ;;  %s789_s4 = scalar_lea.vmem %s92_s25, 32 }
  0x6f   :  { %p786_p9 = scmp.ne.s32.totalorder %s92_s25, %s785_s15  ;;  %p790_p10 = scmp.lt.s32.totalorder %s92_s25, %s92_s25 }
  0x70   :  { %p791_p11 = scmp.lt.s32.totalorder %s789_s4, %s785_s15 }
  0x72   :  { %p792_p12 = por %p791_p11, %p790_p10 }
  0x74   :  { %p793_p13 = pnand %p792_p12, %p786_p9 }
  0x76   :  { %796 = shalt.err (!%p793_p13)
}
  0x77   :  { %94 = dma.hbm_to_vmem [thread:$0]  %s1041_s6, 16, %s92_s25, [#allocation12]  }
  0x78   :  { %819 = dma.done.wait [#allocation3], 128  }
  0x79   :  { %820 = vsyncadd [#allocation3], 4294967168 }
  0x7a   :  { %821 = dma.done.wait [#allocation6], 1040  }
  0x7b   :  { %822 = vsyncadd [#allocation6], 4294966256 }
  0x7c   :  { %823 = dma.done.wait [#allocation9], 1040  }
  0x7d   :  { %824 = vsyncadd [#allocation9], 4294966256 }
  0x7e   :  { %825 = dma.done.wait [#allocation12], 1040  }
  0x7f   :  { %826 = vsyncadd [#allocation12], 4294966256  ;;  %v838_v0 = vmov 0.0   ;;  %vm839_vm0 = vmmov 0   ;;  %v618_v1 = vld [vmem:[#allocation5] sm:$0xff]   ;;  %v619_v2 = vld [vmem:[#allocation5 + $0x8] sm:$0xff]  }
  0x80   :  { %544 = vmatprep.subr.bf16.mxu0 %v838_v0  ;;  %560 = vmatprep.mubr.msk.bf16.mxu0 %vm839_vm0, %v838_v0  ;;  %v620_v3 = vld [vmem:[#allocation5 + $0x10] sm:$0xff]   ;;  %v627_v4 = vld [vmem:[#allocation8] sm:$0xff]   ;;  %v621_v5 = vld [vmem:[#allocation5 + $0x18] sm:$0xff]   ;;  %s840_s6 = smov [#allocation14]  }
  0x81   :  { %564 = vmatprep.subr.bf16.mxu1 %v838_v0  ;;  %580 = vmatprep.mubr.msk.bf16.mxu1 %vm839_vm0, %v838_v0  ;;  %v628_v6 = vld [vmem:[#allocation8 + $0x8] sm:$0xff]   ;;  %v622_v7 = vld [vmem:[#allocation5 + $0x20] sm:$0xff]   ;;  %v629_v8 = vld [vmem:[#allocation8 + $0x10] sm:$0xff]   ;;  %s474_s3 = sshll.u32 %s840_s6, 4  ;;  %s475_s3 = int_to_ptr.vmem [resolvable:$true] %s474_s3 }
  0x82   :  { %545 = vmatpush3.bf16.msra.mxu0 %v618_v1  ;;  %565 = vmatpush3.bf16.msra.mxu1 %v627_v4  ;;  %v623_v9 = vld [vmem:[#allocation5 + $0x28] sm:$0xff]   ;;  %v630_v10 = vld [vmem:[#allocation8 + $0x18] sm:$0xff]   ;;  %v624_v11 = vld [vmem:[#allocation5 + $0x30] sm:$0xff]   ;;  %s797_s0 = scalar_lea.vmem %s475_s3, 256  ;;  %p802_p1 = scmp.lt.s32.totalorder %s475_s3, %s475_s3 }
  0x83   :  { %546 = vmatprep.subr.bf16.mxu0 %v838_v0  ;;  %566 = vmatprep.subr.bf16.mxu1 %v838_v0  ;;  %v631_v12 = vld [vmem:[#allocation8 + $0x20] sm:$0xff]   ;;  %v625_v13 = vld [vmem:[#allocation5 + $0x38] sm:$0xff]   ;;  %v632_v14 = vld [vmem:[#allocation8 + $0x28] sm:$0xff]   ;;  %p798_p0 = scmp.ne.s32.totalorder %s475_s3, %s797_s0  ;;  %p803_p2 = scmp.lt.s32.totalorder %s797_s0, %s797_s0 }
  0x84   :  { %v626_v15 = vld [vmem:[#allocation2] sm:$0xff]   ;;  %v635_v18 = vld [vmem:[#allocation11] sm:$0xff]   ;;  %v636_v19 = vld [vmem:[#allocation11 + $0x8] sm:$0xff]  }
  0x85   :  { %v633_v16 = vld [vmem:[#allocation8 + $0x30] sm:$0xff]   ;;  %v634_v17 = vld [vmem:[#allocation8 + $0x38] sm:$0xff]   ;;  %v639_v22 = vld [vmem:[#allocation11 + $0x20] sm:$0xff]   ;;  %p804_p3 = por %p803_p2, %p802_p1 }
  0x86   :  { %547 = vmatpush3.bf16.msra.mxu0 %v619_v2  ;;  %567 = vmatpush3.bf16.msra.mxu1 %v628_v6  ;;  %v637_v20 = vld [vmem:[#allocation11 + $0x10] sm:$0xff]   ;;  %v638_v21 = vld [vmem:[#allocation11 + $0x18] sm:$0xff]   ;;  %v640_v23 = vld [vmem:[#allocation11 + $0x28] sm:$0xff]  }
  0x87   :  { %548 = vmatprep.subr.bf16.mxu0 %v838_v0  ;;  %568 = vmatprep.subr.bf16.mxu1 %v838_v0  ;;  %v489_v24 = vld [vmem:[#allocation7] ss:$0 sm:$0xff]  ;;  %v641_v34 = vld [vmem:[#allocation11 + $0x30] sm:$0xff]   ;;  %v499_v36 = vld [vmem:[#allocation10] ss:$0 sm:$0xff]  ;;  %p805_p4 = pnand %p804_p3, %p798_p0 }
  0x88   :  { %v642_v35 = vld [vmem:[#allocation11 + $0x38] sm:$0xff]   ;;  %v508_v46 = vld [vmem:[#allocation13] ss:$0 sm:$0xff] }
  0x8a   :  { %549 = vmatpush3.bf16.msra.mxu0 %v620_v3  ;;  %569 = vmatpush3.bf16.msra.mxu1 %v629_v8 }
  0x8b   :  { %550 = vmatprep.subr.bf16.mxu0 %v838_v0  ;;  %570 = vmatprep.subr.bf16.mxu1 %v838_v0 }
  0x8e   :  { %551 = vmatpush3.bf16.msra.mxu0 %v621_v5  ;;  %571 = vmatpush3.bf16.msra.mxu1 %v630_v10 }
  0x8f   :  { %552 = vmatprep.subr.bf16.mxu0 %v838_v0  ;;  %572 = vmatprep.subr.bf16.mxu1 %v838_v0 }
  0x92   :  { %553 = vmatpush3.bf16.msra.mxu0 %v622_v7  ;;  %573 = vmatpush3.bf16.msra.mxu1 %v631_v12 }
  0x93   :  { %554 = vmatprep.subr.bf16.mxu0 %v838_v0  ;;  %574 = vmatprep.subr.bf16.mxu1 %v838_v0 }
  0x96   :  { %555 = vmatpush3.bf16.msra.mxu0 %v623_v9  ;;  %575 = vmatpush3.bf16.msra.mxu1 %v632_v14 }
  0x97   :  { %556 = vmatprep.subr.bf16.mxu0 %v838_v0  ;;  %576 = vmatprep.subr.bf16.mxu1 %v838_v0 }
  0x9a   :  { %557 = vmatpush3.bf16.msra.mxu0 %v624_v11  ;;  %577 = vmatpush3.bf16.msra.mxu1 %v633_v16 }
  0x9b   :  { %558 = vmatprep.subr.bf16.mxu0 %v838_v0  ;;  %578 = vmatprep.subr.bf16.mxu1 %v838_v0 }
  0x9e   :  { %559 = vmatpush3.bf16.msra.mxu0 %v625_v13  ;;  %579 = vmatpush3.bf16.msra.mxu1 %v634_v17 }
  0x9f   :  { %584 = vmatprep.subr.bf16.mxu0 %v838_v0 }
  0xa1   :  { %561 = vmatmul.mubr.bf16.vlgmr.msra.gmra.mrb[0].mxu0 %v626_v15 }
  0xa2   :  { %600 = vmatprep.mubr.msk.bf16.mxu0 %vm839_vm0, %v838_v0  ;;  %585 = vmatpush3.bf16.msra.mxu0 %v635_v18 }
  0xa3   :  { %586 = vmatprep.subr.bf16.mxu0 %v838_v0 }
  0xa6   :  { %587 = vmatpush3.bf16.msra.mxu0 %v636_v19 }
  0xa7   :  { %588 = vmatprep.subr.bf16.mxu0 %v838_v0 }
  0xaa   :  { %589 = vmatpush3.bf16.msra.mxu0 %v637_v20 }
  0xab   :  { %590 = vmatprep.subr.bf16.mxu0 %v838_v0 }
  0xae   :  { %591 = vmatpush3.bf16.msra.mxu0 %v638_v21 }
  0xaf   :  { %592 = vmatprep.subr.bf16.mxu0 %v838_v0 }
  0xb2   :  { %593 = vmatpush3.bf16.msra.mxu0 %v639_v22 }
  0xb3   :  { %594 = vmatprep.subr.bf16.mxu0 %v838_v0 }
  0xb6   :  { %595 = vmatpush3.bf16.msra.mxu0 %v640_v23 }
  0xb7   :  { %596 = vmatprep.subr.bf16.mxu0 %v838_v0 }
  0xba   :  { %597 = vmatpush3.bf16.msra.mxu0 %v641_v34 }
  0xbb   :  { %598 = vmatprep.subr.bf16.mxu0 %v838_v0 }
  0xbe   :  { %599 = vmatpush3.bf16.msra.mxu0 %v642_v35 }
 0x174   :  { %v230_v25 = vpop.f32.mrb[0].mxu0 }
 0x175   :  { %v231_v26 = vadd.f32 %v489_v24, %v230_v25  ;;  %v562_v27 = vpop.f32.mrb[1].mxu0 }
 0x176   :  { %v233_v28 = vpop.f32.mrb[2].mxu0 }
 0x177   :  { %v234_v29 = vadd.f32 %v489_v24, %v233_v28  ;;  %v563_v30 = vpop.f32.mrb[3].mxu0  ;;  %v237_v31 = vmax.f32 %v231_v26, 0.0 }
 0x179   :  { %v238_v32 = vmax.f32 %v234_v29, 0.0 }
 0x17b   :  { %v239_v33 = vpack.c.bf16 %v238_v32, %v237_v31 }
 0x17d   :  { %581 = vmatmul.mubr.bf16.vlgmr.msra.gmra.mrb[0].mxu1 %v239_v33 }
 0x250   :  { %v345_v37 = vpop.f32.mrb[0].mxu1 }
 0x251   :  { %v346_v38 = vadd.f32 %v499_v36, %v345_v37  ;;  %v582_v39 = vpop.f32.mrb[1].mxu1 }
 0x252   :  { %v348_v40 = vpop.f32.mrb[2].mxu1 }
 0x253   :  { %v349_v41 = vadd.f32 %v499_v36, %v348_v40  ;;  %v583_v42 = vpop.f32.mrb[3].mxu1  ;;  %v352_v43 = vmax.f32 %v346_v38, 0.0 }
 0x255   :  { %v353_v44 = vmax.f32 %v349_v41, 0.0 }
 0x257   :  { %v354_v45 = vpack.c.bf16 %v353_v44, %v352_v43 }
 0x259   :  { %601 = vmatmul.mubr.bf16.vlgmr.msra.gmra.mrb[4].mxu0 %v354_v45 }
 0x32c   :  { %v460_v47 = vpop.f32.mrb[4].mxu0 }
 0x32d   :  { %v461_v48 = vadd.f32 %v508_v46, %v460_v47  ;;  %v602_v49 = vpop.f32.mrb[5].mxu0 }
 0x32e   :  { %v463_v50 = vpop.f32.mrb[6].mxu0 }
 0x32f   :  { %467 = vst [vmem:[#allocation14] sm:$0xff] %v461_v48  ;;  %v464_v51 = vadd.f32 %v508_v46, %v463_v50  ;;  %v603_v52 = vpop.f32.mrb[7].mxu0 }
 0x331   :  { %468 = vst [vmem:[#allocation14 + $0x8] sm:$0xff] %v464_v51 }
 0x332   :  { %808 = shalt.err (!%p805_p4)
}
 0x333   :  { %s809_s30 = scalar_lea.hbm %s1042_s7, 256 }
 0x334   :  { %p810_p5 = scmp.ne.s32.totalorder %s1042_s7, %s809_s30  ;;  %p813_p6 = scmp.lt.u32.totalorder %s809_s30, %s1042_s7 }
 0x336   :  { %p815_p7 = pnand %p813_p6, %p810_p5 }
 0x338   :  { %818 = shalt.err (!%p815_p7)
}
 0x339   :  { %s841_s20 = smov 128   ;;  %s842_s21 = smov 8  }
 0x33a   :  { %480 = dma.vmem_to_hbm [thread:$0]  %s475_s3, 256, %s1042_s7, [#allocation4], %s841_s20, %s841_s20, %s842_s21  }
 0x33b   :  { %827 = dma.done.wait [#allocation4], 256  }
 0x33c   :  { %828 = vsyncadd [#allocation4], 4294967040 }
 0x33d   :  { %484 = vsyncpa [#allocation3], 1 }
 0x33e   :  { %485 = vsyncpa [#allocation6], 1 }
 0x33f   :  { %486 = vsyncpa [#allocation9], 1 }
 0x340   :  { %487 = vsyncpa [#allocation12], 1 }
 0x341   :  { %488 = vsyncpa [#allocation4], 1 }

</bundles_post_ra>
